<compile_context>
chip_gen: v5e
topology: v5e:2x2
jax: 0.10.0
libtpu: 0.0.40
codegen_flags: <defaults>
</compile_context>

<pallas_src>
import functools

import jax
import jax.numpy as jnp
from jax.experimental import pallas as pl
from jax.experimental.pallas import tpu as pltpu


_ROW = 1  # the PyTorch module updates row 1: x[1].add_(y)


def _row_add_kernel(x_ref, y_ref, o_ref, *, row_in_tile):
    # Copy the (small) sublane tile holding the target row, then a single
    # static-row add.  No mask generation, no full-tile select.
    o_ref[...] = x_ref[...]
    r = row_in_tile
    o_ref[r:r + 1, :] = x_ref[r:r + 1, :] + y_ref[...]


def inplace_row_add(x, y, row=_ROW):
    """Functional equivalent of `x[row].add_(y)`; returns the updated x.

    Only the sublane tile containing `row` is moved through VMEM; the rest of
    x stays in place because the output aliases x's buffer.
    """
    R, C = x.shape
    y2d = jnp.reshape(y, (1, C)).astype(x.dtype)

    # --- row (sublane) tiling: touch only the tile holding `row` -----------
    TR = 8 if R >= 8 else R          # f32 sublane tile; full dim when tiny
    row_block = row // TR
    row_in_tile = row % TR

    # --- lane tiling: 128-multiple blocks when possible (lane-dense stores) -
    TC = C
    for cand in (1024, 512, 256, 128):
        if C % cand == 0:
            TC = cand
            break
    grid = (C // TC,)

    kernel = functools.partial(_row_add_kernel, row_in_tile=row_in_tile)

    out = pl.pallas_call(
        kernel,
        out_shape=jax.ShapeDtypeStruct((R, C), x.dtype),
        grid=grid,
        in_specs=[
            pl.BlockSpec((TR, TC), lambda j: (row_block, j)),   # x: row tile only
            pl.BlockSpec((1, TC), lambda j: (0, j)),            # y: matching lanes
        ],
        out_specs=pl.BlockSpec((TR, TC), lambda j: (row_block, j)),
        # Emulate torch's in-place add: output reuses x's buffer, so rows
        # outside the written tile retain their original values.
        input_output_aliases={0: 0},
        compiler_params=pltpu.CompilerParams(
            dimension_semantics=("parallel",)),
    )(x, y2d)
    return out


if __name__ == "__main__":
    key = jax.random.PRNGKey(0)
    kx, ky = jax.random.split(key)

    # Shapes implied by the module: x = (2, 2), y = (2,)
    x = jax.random.normal(kx, (2, 2), dtype=jnp.float32)
    y = jax.random.normal(ky, (2,), dtype=jnp.float32)
    expected = x.at[_ROW].add(y)

    out = inplace_row_add(x, y)
    jax.block_until_ready(out)
    assert jnp.allclose(out, expected, atol=1e-6), (out, expected)

    # Also exercise the general path (8-row sublane tile + 128-lane grid,
    # untouched rows carried by the alias).
    xl = jax.random.normal(kx, (16, 384), dtype=jnp.float32)
    yl = jax.random.normal(ky, (384,), dtype=jnp.float32)
    out_l = inplace_row_add(xl, yl)
    jax.block_until_ready(out_l)
    assert jnp.allclose(out_l, xl.at[_ROW].add(yl), atol=1e-6)

    print("KERNEL_OK")
</pallas_src>

<mosaic_0001>
module attributes {stable_mosaic.version = 11 : i64} {
  func.func @_row_add_kernel(%arg0: i32, %arg1: memref<2x2xf32, #tpu.memory_space<vmem>>, %arg2: memref<1x2xf32, #tpu.memory_space<vmem>>, %arg3: memref<2x2xf32, #tpu.memory_space<vmem>>) attributes {dimension_semantics = [#tpu.dimension_semantics<parallel>], iteration_bounds = array<i64: 1>, scalar_prefetch = 0 : i64, scratch_operands = 0 : i64, tpu.core_type = #tpu.core_type<tc>, window_params = [{transform_indices = @transform_0, window_bounds = array<i64: 2, 2>}, {transform_indices = @transform_1, window_bounds = array<i64: 1, 2>}, {transform_indices = @transform_2, window_bounds = array<i64: 2, 2>}]} {
    %c0 = arith.constant 0 : index
    %c0_0 = arith.constant 0 : index
    %0 = vector.load %arg1[%c0, %c0_0] : memref<2x2xf32, #tpu.memory_space<vmem>>, vector<2x2xf32>
    %c0_1 = arith.constant 0 : index
    %c0_2 = arith.constant 0 : index
    %1 = vector.load %arg3[%c0_1, %c0_2] : memref<2x2xf32, #tpu.memory_space<vmem>>, vector<2x2xf32>
    tpu.vector_store %arg3[%c0_1, %c0_2], %0 {strides = array<i32>} : memref<2x2xf32, #tpu.memory_space<vmem>>, vector<2x2xf32>,
    %c1 = arith.constant 1 : index
    %c0_3 = arith.constant 0 : index
    %2 = vector.load %arg1[%c1, %c0_3] : memref<2x2xf32, #tpu.memory_space<vmem>>, vector<1x2xf32>
    %c0_4 = arith.constant 0 : index
    %c0_5 = arith.constant 0 : index
    %3 = vector.load %arg2[%c0_4, %c0_5] : memref<1x2xf32, #tpu.memory_space<vmem>>, vector<1x2xf32>
    %4 = arith.addf %2, %3 : vector<1x2xf32>
    %c1_6 = arith.constant 1 : index
    %c0_7 = arith.constant 0 : index
    %5 = vector.load %arg3[%c1_6, %c0_7] : memref<2x2xf32, #tpu.memory_space<vmem>>, vector<1x2xf32>
    tpu.vector_store %arg3[%c1_6, %c0_7], %4 {strides = array<i32>} : memref<2x2xf32, #tpu.memory_space<vmem>>, vector<1x2xf32>,
    return
  }
  func.func @transform_0(%arg0: i32) -> (i32, i32) {
    %c0_i32 = arith.constant 0 : i32
    %c0_i32_0 = arith.constant 0 : i32
    return %c0_i32, %arg0 : i32, i32
  }
  func.func @transform_1(%arg0: i32) -> (i32, i32) {
    %c0_i32 = arith.constant 0 : i32
    %c0_i32_0 = arith.constant 0 : i32
    return %c0_i32, %arg0 : i32, i32
  }
  func.func @transform_2(%arg0: i32) -> (i32, i32) {
    %c0_i32 = arith.constant 0 : i32
    %c0_i32_0 = arith.constant 0 : i32
    return %c0_i32, %arg0 : i32, i32
  }
}

</mosaic_0001>

<bundles_post_ra>
// kernel: tpu_custom_call.1
= control target key start
LH: loop header
LB: loop body
LE: loop exit
PB: predicated region body
PF: predicated region fallthrough
CT: control target
= control target key end

     0   :  { %7 = vsyncpa [#allocation3], 0  ;;  %s131_s0 = inlined_call_operand.hbm [shape: f32[2,2], index: 0, kind: input, shape index: {}, may-alias: {0,2}]   ;;  %s132_s1 = inlined_call_operand.vmem [shape: f32[1,2], index: 1, kind: input, shape index: {}]   ;;  %s133_s2 = inlined_call_operand.hbm [shape: f32[2,2], index: 2, kind: output, shape index: {}, may-alias: {0,2}]  }
   0x1   :  { %8 = vsyncpa [#allocation4], 0  ;;  %s14_s11 = sshll.u32 %s131_s0, 4  ;;  %s105_s12 = smov [#allocation2]   ;;  %s15_s11 = int_to_ptr.hbm [resolvable:$true] %s14_s11 }
   0x2   :  { %s16_s13 = sshll.u32 %s105_s12, 4  ;;  %s17_s13 = int_to_ptr.vmem [resolvable:$true] %s16_s13 }
   0x3   :  { %19 = dma.hbm_to_vmem [thread:$0]  %s15_s11, 32, %s17_s13, [#allocation3]  }
   0x4   :  { %101 = dma.done.wait [#allocation3], 32  }
   0x5   :  { %102 = vsyncadd [#allocation3], 4294967264  ;;  %vm27_vm0 = vcmask 9216   ;;  %s106_s14 = smov [#allocation5]   ;;  %s41_s18 = sshll.u32 %s133_s2, 4  ;;  %vm32_vm1 = vcmask 8192   ;;  %s42_s18 = int_to_ptr.hbm [resolvable:$true] %s41_s18 }
   0x6   :  { %s39_s15 = sshll.u32 %s106_s14, 4  ;;  %v26_v0 = vld [vmem:[#allocation2] sm:$0x3]  ;;  %s40_s15 = int_to_ptr.vmem [resolvable:$true] %s39_s15 }
   0x7   :  { %v29_v1 = vld [vmem:[#allocation2 + $0x1] sm:$0x1]  ;;  %v30_v2 = vld [vmem:[%s132_s1] sm:$0x1]  ;;  %28 = vst.msk [vmem:[#allocation5] sm:$0x3] %vm27_vm0, %v26_v0 }
   0x8   :  { %v31_v3 = vadd.f32 %v30_v2, %v29_v1 }
   0xa   :  { %33 = vst.msk [vmem:[#allocation5 + $0x1] sm:$0x1] %vm32_vm1, %v31_v3 }
   0xb   :  { %44 = dma.vmem_to_hbm [thread:$0]  %s40_s15, 32, %s42_s18, [#allocation4]  }
   0xc   :  { %103 = dma.done.wait [#allocation4], 32  }
   0xd   :  { %104 = vsyncadd [#allocation4], 4294967264 }
   0xe   :  { %49 = vsyncpa [#allocation3], 1 }
   0xf   :  { %50 = vsyncpa [#allocation4], 1 }

</bundles_post_ra>
